<compile_context>
chip_gen: v5e
topology: v5e:2x2
jax: 0.10.0
libtpu: 0.0.40
codegen_flags: <defaults>
</compile_context>

<pallas_src>
import jax
import jax.numpy as jnp
from jax.experimental import pallas as pl
from jax.experimental.pallas import tpu as pltpu

BN_EPS = 1e-5


def _pos_embed_kernel(x_ref, w1_ref, w2_ref, b2_ref, o_ref):
    """One output tile: (scale*W1 @ x + shift) -> ReLU -> W2 @ h + b2."""
    # x_ref:  (1, CP, T)  channel-padded input tile (row C is the ones channel)
    # w1_ref: (F, CP)     BN-scale-folded conv1 weight; column C holds the BN shift
    # w2_ref: (F, F)      conv2 weight
    # b2_ref: (F, 1)      conv2 bias
    # o_ref:  (1, F, T)   output tile (final (B, F, N) layout -> lane-dense stores)
    x = x_ref[0]
    h = jnp.dot(w1_ref[...], x, preferred_element_type=jnp.float32)  # MXU: scale*W1@x + shift
    h = jnp.maximum(h, 0.0)                                          # ReLU
    out = jnp.dot(w2_ref[...], h, preferred_element_type=jnp.float32)
    o_ref[0] = (out + b2_ref[...]).astype(o_ref.dtype)


def _pick_tile_n(n, f, cp, target, vmem_budget=24 * 1024 * 1024):
    """Lane tile along N: multiple of 128; double-buffered f32 in+out tiles fit budget."""
    cap = vmem_budget // (2 * 4 * (f + cp))          # lanes allowed by the VMEM budget
    cap = max(128, (cap // 128) * 128)
    t = max(128, min((max(target, 128) // 128) * 128, cap))
    n128 = -(-n // 128) * 128
    if n128 <= t:
        return n128                                   # one tile covers (padded) N
    if n % 128 == 0:
        # Prefer a divisor of N close to the target: no padding, no output re-slice.
        d = t
        while d >= max(128, t // 2):
            if n % d == 0:
                return d
            d -= 128
    return t                                          # wrapper pads N to a multiple of t


def position_embedding_learned(xyz, params, *, tile_n=8192, out_dtype=jnp.float32):
    """xyz: (B, N, C) float -> (B, F, N) out_dtype, matching the PyTorch forward."""
    B, N, C = xyz.shape
    w1, b1, gamma, beta, w2, b2 = params
    F = w1.shape[0]
    del b1  # conv1 bias cancels exactly under training-mode BN (dropped consistently below)

    w1f = w1.astype(jnp.float32)
    gamma = gamma.reshape(-1).astype(jnp.float32)
    beta = beta.reshape(-1).astype(jnp.float32)
    M = B * N

    # ---- BN batch statistics from input moments (plain XLA, O(M*C^2)) ----
    x_flat = xyz.reshape(M, C).astype(jnp.float32)
    mean_x = jnp.mean(x_flat, axis=0)                          # (C,)
    xc = x_flat - mean_x
    cov_x = (xc.T @ xc) / M                                    # (C, C), biased (PyTorch norm)
    mean_h = w1f @ mean_x                                      # (F,)  (b1 dropped consistently)
    var_h = jnp.maximum(jnp.einsum("fc,cd,fd->f", w1f, cov_x, w1f), 0.0)
    inv_std = jax.lax.rsqrt(var_h + BN_EPS)
    scale = gamma * inv_std                                    # (F,)
    shift = beta - mean_h * scale                              # (F,)

    # ---- fold BN into the first matmul: scale into W1, shift into a ones channel ----
    CP = ((C + 1 + 7) // 8) * 8                                # sublane/MXU-aligned channels
    w1_aug = jnp.zeros((F, CP), jnp.float32)
    w1_aug = w1_aug.at[:, :C].set(scale[:, None] * w1f)
    w1_aug = w1_aug.at[:, C].set(shift)

    # ---- tiling along N (pad to a tile multiple; padded columns sliced off) ----
    tn = _pick_tile_n(N, F, CP, target=tile_n)
    n_pad = -(-N // tn) * tn

    # Channels-first, channel-padded input: rows [0, C) = coords, row C = 1, rest 0.
    x_t = jnp.transpose(xyz, (0, 2, 1)).astype(jnp.float32)    # (B, C, N) — same cheap transpose
    x_cf = jnp.concatenate([x_t, jnp.ones((B, 1, N), jnp.float32)], axis=1)
    x_cf = jnp.pad(x_cf, ((0, 0), (0, CP - (C + 1)), (0, n_pad - N)))

    grid = (B, n_pad // tn)
    out = pl.pallas_call(
        _pos_embed_kernel,
        out_shape=jax.ShapeDtypeStruct((B, F, n_pad), out_dtype),
        grid=grid,
        in_specs=[
            pl.BlockSpec((1, CP, tn), lambda b, j: (b, 0, j)),
            pl.BlockSpec((F, CP), lambda b, j: (0, 0)),        # VMEM-resident weights
            pl.BlockSpec((F, F), lambda b, j: (0, 0)),
            pl.BlockSpec((F, 1), lambda b, j: (0, 0)),
        ],
        out_specs=pl.BlockSpec((1, F, tn), lambda b, j: (b, 0, j)),
        compiler_params=pltpu.CompilerParams(
            dimension_semantics=("parallel", "parallel"),      # all tiles independent
            vmem_limit_bytes=32 * 1024 * 1024),
        cost_estimate=pl.CostEstimate(
            flops=B * n_pad * (2 * CP * F + 2 * F * F + F),
            transcendentals=0,
            bytes_accessed=4 * (B * n_pad * CP + B * n_pad * F + F * (CP + F + 1))),
    )(x_cf, w1_aug, w2.astype(jnp.float32), b2.reshape(F, 1).astype(jnp.float32))

    if n_pad != N:
        out = out[:, :, :N]
    return out


def init_params(key, input_channel, num_pos_feats):
    """Deterministic synthetic parameters (PyTorch (out, in) weight layout)."""
    k1, k2, k3, k4 = jax.random.split(key, 4)
    C, F = input_channel, num_pos_feats
    w1 = jax.random.normal(k1, (F, C), jnp.float32) * 0.1    # Conv1d(C, F, 1).weight
    b1 = jax.random.normal(k2, (F, 1), jnp.float32) * 0.1    # Conv1d(C, F, 1).bias
    gamma = jnp.ones((F, 1), jnp.float32)                    # BatchNorm1d.weight
    beta = jnp.zeros((F, 1), jnp.float32)                    # BatchNorm1d.bias
    w2 = jax.random.normal(k3, (F, F), jnp.float32) * 0.1    # Conv1d(F, F, 1).weight
    b2 = jax.random.normal(k4, (F, 1), jnp.float32) * 0.1    # Conv1d(F, F, 1).bias
    return (w1, b1, gamma, beta, w2, b2)


def _reference(xyz, params):
    """Pure-JAX reference of the full PyTorch math (training-mode BN, incl. b1)."""
    w1, b1, gamma, beta, w2, b2 = params
    B, N, C = xyz.shape
    h = xyz.reshape(B * N, C) @ w1.T + b1[:, 0]
    mean = h.mean(0, keepdims=True)
    var = ((h - mean) ** 2).mean(0, keepdims=True)
    h = (h - mean) / jnp.sqrt(var + BN_EPS) * gamma[:, 0] + beta[:, 0]
    h = jnp.maximum(h, 0.0)
    return (h @ w2.T + b2[:, 0]).reshape(B, N, -1).transpose(0, 2, 1)


if __name__ == "__main__":
    key = jax.random.PRNGKey(0)
    kx, kp, kx2 = jax.random.split(key, 3)

    B, N, C = 2, 256, 3      # small demo; N multiple of 128 exercises multi-tile grid
    F = 32                   # num_pos_feats (small for the demo)

    xyz = jax.random.normal(kx, (B, N, C), jnp.float32)
    params = init_params(kp, C, F)

    out = jax.block_until_ready(position_embedding_learned(xyz, params, tile_n=128))  # grid (2, 2)
    ref = _reference(xyz, params)
    assert out.shape == (B, F, N)
    err = float(jnp.max(jnp.abs(out - ref)))
    assert jnp.allclose(out, ref, atol=1e-4, rtol=1e-4), err

    # Ragged N: exercises the pad-and-slice path that replaced the unsafe
    # full-extent (F, N) fallback flagged in the review.
    N2 = 200
    xyz2 = jax.random.normal(kx2, (B, N2, C), jnp.float32)
    out2 = jax.block_until_ready(position_embedding_learned(xyz2, params))
    ref2 = _reference(xyz2, params)
    assert out2.shape == (B, F, N2)
    err2 = float(jnp.max(jnp.abs(out2 - ref2)))
    assert jnp.allclose(out2, ref2, atol=1e-4, rtol=1e-4), err2

    print("KERNEL_OK")
</pallas_src>

<mosaic_0001>
module attributes {stable_mosaic.version = 11 : i64} {
  func.func @_pos_embed_kernel(%arg0: i32, %arg1: i32, %arg2: memref<1x8x128xf32, #tpu.memory_space<vmem>>, %arg3: memref<32x8xf32, #tpu.memory_space<vmem>>, %arg4: memref<32x32xf32, #tpu.memory_space<vmem>>, %arg5: memref<32x1xf32, #tpu.memory_space<vmem>>, %arg6: memref<1x32x128xf32, #tpu.memory_space<vmem>>) attributes {dimension_semantics = [#tpu.dimension_semantics<parallel>, #tpu.dimension_semantics<parallel>], iteration_bounds = array<i64: 2, 2>, scalar_prefetch = 0 : i64, scratch_operands = 0 : i64, tpu.core_type = #tpu.core_type<tc>, window_params = [{transform_indices = @transform_0, window_bounds = array<i64: 1, 8, 128>}, {pipeline_mode = #tpu.pipeline_mode<synchronous>, transform_indices = @transform_1, window_bounds = array<i64: 32, 8>}, {pipeline_mode = #tpu.pipeline_mode<synchronous>, transform_indices = @transform_2, window_bounds = array<i64: 32, 32>}, {pipeline_mode = #tpu.pipeline_mode<synchronous>, transform_indices = @transform_3, window_bounds = array<i64: 32, 1>}, {transform_indices = @transform_4, window_bounds = array<i64: 1, 32, 128>}]} {
    %c0 = arith.constant 0 : index
    %c0_0 = arith.constant 0 : index
    %c0_1 = arith.constant 0 : index
    %0 = vector.load %arg2[%c0, %c0_0, %c0_1] : memref<1x8x128xf32, #tpu.memory_space<vmem>>, vector<1x8x128xf32>
    %1 = vector.shape_cast %0 : vector<1x8x128xf32> to vector<8x128xf32>
    %c0_2 = arith.constant 0 : index
    %c0_3 = arith.constant 0 : index
    %2 = vector.load %arg3[%c0_2, %c0_3] : memref<32x8xf32, #tpu.memory_space<vmem>>, vector<32x8xf32>
    %cst = arith.constant dense<0.000000e+00> : vector<32x128xf32>
    %3 = tpu.matmul %2, %1, %cst {dimension_numbers = #tpu.dot_dimension_numbers<[1], [0], [0], [1], [0, 0, 1, 1], [], []>} : vector<32x8xf32>, vector<8x128xf32>, vector<32x128xf32> -> vector<32x128xf32>
    %cst_4 = arith.constant 0.000000e+00 : f32
    %4 = vector.broadcast %cst_4 : f32 to vector<32x128xf32>
    %5 = arith.maximumf %3, %4 : vector<32x128xf32>
    %c0_5 = arith.constant 0 : index
    %c0_6 = arith.constant 0 : index
    %6 = vector.load %arg4[%c0_5, %c0_6] : memref<32x32xf32, #tpu.memory_space<vmem>>, vector<32x32xf32>
    %cst_7 = arith.constant dense<0.000000e+00> : vector<32x128xf32>
    %7 = tpu.matmul %6, %5, %cst_7 {dimension_numbers = #tpu.dot_dimension_numbers<[1], [0], [0], [1], [0, 0, 1, 1], [], []>} : vector<32x32xf32>, vector<32x128xf32>, vector<32x128xf32> -> vector<32x128xf32>
    %c0_8 = arith.constant 0 : index
    %c0_9 = arith.constant 0 : index
    %8 = vector.load %arg5[%c0_8, %c0_9] : memref<32x1xf32, #tpu.memory_space<vmem>>, vector<32x1xf32>
    %9 = vector.broadcast %8 : vector<32x1xf32> to vector<32x128xf32>
    %10 = arith.addf %7, %9 : vector<32x128xf32>
    %c0_10 = arith.constant 0 : index
    %c0_11 = arith.constant 0 : index
    %c0_12 = arith.constant 0 : index
    %11 = vector.load %arg6[%c0_10, %c0_11, %c0_12] : memref<1x32x128xf32, #tpu.memory_space<vmem>>, vector<1x32x128xf32>
    %12 = vector.shape_cast %11 : vector<1x32x128xf32> to vector<32x128xf32>
    %13 = vector.shape_cast %10 : vector<32x128xf32> to vector<1x32x128xf32>
    tpu.vector_store %arg6[%c0_10, %c0_11, %c0_12], %13 {strides = array<i32>} : memref<1x32x128xf32, #tpu.memory_space<vmem>>, vector<1x32x128xf32>,
    return
  }
  func.func @transform_0(%arg0: i32, %arg1: i32) -> (i32, i32, i32) {
    %c0_i32 = arith.constant 0 : i32
    %c0_i32_0 = arith.constant 0 : i32
    return %arg0, %c0_i32, %arg1 : i32, i32, i32
  }
  func.func @transform_1(%arg0: i32, %arg1: i32) -> (i32, i32) {
    %c0_i32 = arith.constant 0 : i32
    %c0_i32_0 = arith.constant 0 : i32
    %c0_i32_1 = arith.constant 0 : i32
    return %c0_i32, %c0_i32_0 : i32, i32
  }
  func.func @transform_2(%arg0: i32, %arg1: i32) -> (i32, i32) {
    %c0_i32 = arith.constant 0 : i32
    %c0_i32_0 = arith.constant 0 : i32
    %c0_i32_1 = arith.constant 0 : i32
    return %c0_i32, %c0_i32_0 : i32, i32
  }
  func.func @transform_3(%arg0: i32, %arg1: i32) -> (i32, i32) {
    %c0_i32 = arith.constant 0 : i32
    %c0_i32_0 = arith.constant 0 : i32
    %c0_i32_1 = arith.constant 0 : i32
    return %c0_i32, %c0_i32_0 : i32, i32
  }
  func.func @transform_4(%arg0: i32, %arg1: i32) -> (i32, i32, i32) {
    %c0_i32 = arith.constant 0 : i32
    %c0_i32_0 = arith.constant 0 : i32
    return %arg0, %c0_i32, %arg1 : i32, i32, i32
  }
}

</mosaic_0001>

<bundles_post_ra>
// kernel: tpu_custom_call.1
= control target key start
LH: loop header
LB: loop body
LE: loop exit
PB: predicated region body
PF: predicated region fallthrough
CT: control target
= control target key end

     0   :  { %9 = vsyncpa [#allocation3], 0  ;;  %s830_s0 = inlined_call_operand.vmem [shape: f32[2,8,256], index: 0, kind: input, shape index: {}]   ;;  %s831_s1 = inlined_call_operand.vmem [shape: f32[32,8], index: 1, kind: input, shape index: {}]   ;;  %s832_s2 = inlined_call_operand.vmem [shape: f32[32,32], index: 2, kind: input, shape index: {}]   ;;  %s833_s3 = inlined_call_operand.vmem [shape: f32[32,1], index: 3, kind: input, shape index: {}]   ;;  %s834_s4 = inlined_call_operand.hbm [shape: f32[2,32,256], index: 4, kind: output, shape index: {}]  }
   0x1   :  { %11 = vsyncpa [#allocation3 + $0x1], 0  ;;  %s672_s15 = smov 0   ;;  %s674_s16 = smov 0  }
   0x2   :  { %s676_s17 = smov 0   ;;  %s678_s18 = smov 0  }
   0x3   :  { %s680_s19 = smov 0   ;;  %s682_s20 = smov 0  }
   0x4   :  { %s684_s21 = smov 0   ;;  %s686_s22 = smov 0  }
   0x5 LB: > { %s444_s23 = sadd.s32 4294967295, %s641_s22   ;;  %s445_s24 = sadd.s32 4294967294, %s641_s22   ;;  %s641_s22 = sphi %s686_s22, %s17_s22   ;;  %s637_s21 = sphi %s684_s21, %s843_s21   ;;  %s633_s20 = sphi %s682_s20, %s842_s20   ;;  %s629_s19 = sphi %s680_s19, %s841_s19   ;;  %s625_s18 = sphi %s678_s18, %s840_s18   ;;  %s621_s17 = sphi %s676_s17, %s839_s17   ;;  %s617_s16 = sphi %s674_s16, %s838_s16   ;;  %s613_s15 = sphi %s672_s15, %s837_s15  }
   0x6   : > { %s26_s25 = sadd.s32 1, %s633_s20  ;;  %s29_s26 = sadd.s32 1, %s637_s21 }
   0x7   : > { %p27_p0 = scmp.ge.s32.totalorder %s26_s25, 2  ;;  %p139_p1 = scmp.ne.s32.totalorder %s621_s17, %s617_s16 }
   0x8   : > { %p140_p2 = scmp.eq.s32.totalorder %s444_s23, 3  ;;  %p145_p5 = scmp.ne.s32.totalorder %s617_s16, %s613_s15 }
   0x9   : > { %s845_s25 = smov (%p27_p0, %s26_s25), 0  ;;  %s847_s26 = smov (!%p27_p0, %s29_s26), %s637_s21 }
   0xa   : > { %s125_s27 = ssub.s32 %s633_s20, %s845_s25  ;;  %p723_p3 = por %p140_p2, %p139_p1 }
   0xb   : > { %p31_p4 = scmp.ge.s32.totalorder %s847_s26, 2  ;;  %p146_p6 = scmp.eq.s32.totalorder %s445_s24, 3 }
   0xc   : > { %p448_p7 = scmp.ge.s32.totalorder %s641_s22, 1  ;;  %p184_p9 = scmp.lt.s32.totalorder %s641_s22, 5 }
   0xd   : > { %s849_s26 = smov (%p31_p4, %s847_s26), 0  ;;  %p732_p8 = por %p146_p6, %p145_p5 }
   0xe   : > { %s124_s30 = ssub.s32 %s637_s21, %s849_s26  ;;  %s129_s5 = sadd.s32 1, %s621_s17 }
   0xf   : > { %s126_s6 = sor.u32 %s125_s27, %s124_s30  ;;  %p185_p10 = pnand %p448_p7, %p184_p9 }
  0x10   : > { %p127_p11 = scmp.eq.s32.totalorder %s126_s6, 0  ;;  %p213_p12 = scmp.lt.s32.totalorder (!%p185_p10), %s629_s19, 1 }
  0x11   : > { %188 = sbr.rel (%p185_p10) target bundleno = 334 (0x14e), region = 36  ;;  %p215_p13 = scmp.lt.s32.totalorder (!%p185_p10), %s625_s18, 1 }
  0x12   : > { %s741_s7 = scalar_select %p127_p11, %s621_s17, %s129_s5  }
  0x13   : > { %s210_s14 = sand.u32 (!%p185_p10), 1, %s617_s16   ;;  %s461_s24 = sshll.u32 (!%p185_p10), %s629_s19, 3 }
  0x14   : > { %s357_s27 = sadd.s32 (!%p185_p10), %s625_s18, %s461_s24  ;;  %s567_s24 = scalar_lea.hbm (!%p185_p10), %s834_s4, 128 }
  0x15   : > { %s462_s5 = sshll.u32 (!%p185_p10), %s357_s27, 3 }
  0x16   : > { %s214_s8 = scalar_select %p213_p12, %s629_s19, 1  ;;  %v223_v0 = vld [vmem:[%s831_s1 + $0x8] sm:$0xff]  ;;  %vm226_vm0 = vcmask 64512   ;;  %v222_v1 = vld [vmem:[%s831_s1] sm:$0xff]  ;;  %v224_v3 = vld [vmem:[%s831_s1 + $0x10] sm:$0xff]  ;;  %v643_v5 = vmov 0  }
  0x17   : > { %s216_s9 = scalar_select %p215_p13, %s625_s18, 1  ;;  %v225_v4 = vld [vmem:[%s831_s1 + $0x18] sm:$0xff]  ;;  %546 = vset.pattern.permute.xlu1 %v643_v5  ;;  %545 = vset.pattern.permute.xlu0 %v643_v5  ;;  %v278_v7 = vld [vmem:[%s833_s3 + $0x10] sm:$0xff]  ;;  %v276_v8 = vld [vmem:[%s833_s3] sm:$0xff]  ;;  %vm300_vm1 = vcmask 261120  }
  0x18   : > { %s450_s10 = sshll.u32 %s214_s8, 1  ;;  %292 = vperm.xlu1 %546, %v278_v7   ;;  %282 = vperm.xlu0 %545, %v276_v8   ;;  %v279_v10 = vld [vmem:[%s833_s3 + $0x18] sm:$0xff]  ;;  %v277_v11 = vld [vmem:[%s833_s3 + $0x8] sm:$0xff]  ;;  %v272_v18 = vld [vmem:[%s832_s2] sm:$0xff]  ;;  %s347_s18 = scalar_lea.sflag [#allocation3], %s210_s14 }
  0x19   : > { %s218_s11 = sadd.s32 %s450_s10, %s216_s9  ;;  %v274_v19 = vld [vmem:[%s832_s2 + $0x10] sm:$0xff]  ;;  %v273_v20 = vld [vmem:[%s832_s2 + $0x8] sm:$0xff]  ;;  %v275_v21 = vld [vmem:[%s832_s2 + $0x18] sm:$0xff]  ;;  %s359_s9 = scalar_lea.hbm %s834_s4, %s462_s5 }
  0x1a   : > { %s451_s12 = sshll.u32 %s218_s11, 3  ;;  %s362_s19 = sshll.u32 %s359_s9, 4  ;;  %s363_s19 = int_to_ptr.hbm [resolvable:$true] %s362_s19 }
  0x1b   : > { %s220_s23 = scalar_lea.vmem %s830_s0, %s451_s12  ;;  %s561_s11 = sshra.s32 %s363_s19, 4  ;;  %s562_s11 = int_to_ptr.hbm [resolvable:$true] %s561_s11 }
  0x1c   : > { %v221_v2 = vld [vmem:[%s220_s23] sm:$0xff]  ;;  %s449_s23 = sshll.u32 %s210_s14, 5  ;;  %s563_s12 = scalar_lea.hbm %s562_s11, 32 }
  0x1d   : > { %465 = vmatpush.msra.mxu3 %v221_v2  ;;  %254 = vmatpush.msra.mxu0 %v221_v2  ;;  %s212_s30 = scalar_lea.vmem [#allocation2], %s449_s23  ;;  %p564_p0 = scmp.ne.s32.totalorder %s562_s11, %s563_s12 }
  0x1e   : > { %453 = vmatmul.msk.f32.vlgmr.msra.gmra.mxu3 %vm226_vm0, %v223_v0  ;;  %452 = vmatmul.msk.f32.vlgmr.msra.gmra.mxu0 %vm226_vm0, %v222_v1  ;;  %s360_s10 = sshll.u32 %s212_s30, 4  ;;  %p568_p4 = scmp.lt.s32.totalorder %s562_s11, %s834_s4  ;;  %s361_s10 = int_to_ptr.vmem [resolvable:$true] %s360_s10 }
  0x1f   : > { %p565_p1 = pnand %p564_p0, %p723_p3  ;;  %p569_p5 = scmp.lt.s32.totalorder %s567_s24, %s563_s12 }
  0x20   : > { %297 = vperm.xlu1 %546, %v279_v10   ;;  %287 = vperm.xlu0 %545, %v277_v11  }
  0x21   : > { %p566_p2 = pneg %p565_p1  ;;  %p570_p6 = por %p569_p5, %p568_p4 }
  0x23   : > { %p571_p7 = pnand %p570_p6, %p566_p2 }
  0x26   : > { %454 = vmatmul.msk.f32.gmra.mxu3 %vm226_vm0, %v224_v3 }
  0x2e   : > { %455 = vmatmul.msk.f32.gmra.mxu3 %vm226_vm0, %v225_v4 }
  0x8a   : > { %v283_v22 = vpop.permute.xlu0 %282  ;;  %v293_v25 = vpop.permute.xlu1 %292 }
  0x92   : > { %v288_v28 = vpop.permute.xlu0 %287  ;;  %v298_v31 = vpop.permute.xlu1 %297 }
  0x9b   : > { %v256_v14 = vpop.f32.mrf.mxu0 }
  0x9c   : > { %v268_v17 = vmax.f32 %v256_v14, 0.0 }
  0xa1   : > { %v259_v6 = vpop.f32.mrf.mxu3 }
  0xa2   : > { %v269_v16 = vmax.f32 %v259_v6, 0.0 }
  0xa9   : > { %v262_v9 = vpop.f32.mrf.mxu3 }
  0xaa   : > { %v270_v15 = vmax.f32 %v262_v9, 0.0 }
  0xb1   : > { %v265_v12 = vpop.f32.mrf.mxu3 }
  0xb2   : > { %v271_v13 = vmax.f32 %v265_v12, 0.0 }
  0xb4   : > { %325 = vmatpush.msra.mxu1 %v271_v13  ;;  %466 = vmatpush.msra.mxu2 %v271_v13 }
  0xb6   : > { %326 = vmatpush.msra.mxu1 %v270_v15  ;;  %467 = vmatpush.msra.mxu2 %v270_v15 }
  0xb8   : > { %327 = vmatpush.msra.mxu1 %v269_v16  ;;  %468 = vmatpush.msra.mxu2 %v269_v16 }
  0xba   : > { %328 = vmatpush.msra.mxu1 %v268_v17  ;;  %469 = vmatpush.msra.mxu2 %v268_v17 }
  0xbb   : > { %456 = vmatmul.msk.f32.vlgmr.msra.gmra.mxu1 %vm300_vm1, %v272_v18  ;;  %458 = vmatmul.msk.f32.vlgmr.msra.gmra.mxu2 %vm300_vm1, %v274_v19 }
  0xc3   : > { %457 = vmatmul.msk.f32.gmra.mxu1 %vm300_vm1, %v273_v20  ;;  %459 = vmatmul.msk.f32.gmra.mxu2 %vm300_vm1, %v275_v21 }
 0x138   : > { %v330_v23 = vpop.f32.mrf.mxu1 }
 0x139   : > { %v331_v24 = vadd.f32 %v330_v23, %v283_v22 }
 0x13b   : > { %342 = vst [vmem:[%s212_s30] sm:$0xff] %v331_v24 }
 0x13e   : > { %v336_v26 = vpop.f32.mrf.mxu2 }
 0x13f   : > { %v337_v27 = vadd.f32 %v336_v26, %v293_v25 }
 0x140   : > { %v333_v29 = vpop.f32.mrf.mxu1 }
 0x141   : > { %344 = vst [vmem:[%s212_s30 + $0x10] sm:$0xff] %v337_v27  ;;  %v334_v30 = vadd.f32 %v333_v29, %v288_v28 }
 0x143   : > { %343 = vst [vmem:[%s212_s30 + $0x8] sm:$0xff] %v334_v30 }
 0x146   : > { %v339_v32 = vpop.f32.mrf.mxu2 }
 0x147   : > { %v340_v33 = vadd.f32 %v339_v32, %v298_v31 }
 0x149   : > { %345 = vst [vmem:[%s212_s30 + $0x18] sm:$0xff] %v340_v33 }
 0x14a   : > { %574 = shalt.err (!%p571_p7)
}
 0x14b   : > { %s644_s14 = smov 128   ;;  %s645_s30 = smov 256  }
 0x14c   : > { %s646_s6 = smov 8  }
 0x14d   : > { %470 = dma.vmem_to_hbm [thread:$0]  (%p723_p3), %s361_s10, 512, %s363_s19, %s347_s18, %s644_s14, %s645_s30, %s646_s6  }
 0x14e PF: > { %p476_p9 = scmp.ge.s32.totalorder %s641_s22, 2  ;;  %s377_s8 = sand.u32 1, %s613_s15  }
 0x14f   : > { %s378_s9 = scalar_lea.sflag [#allocation3], %s377_s8 }
 0x150   : > { %p473_p10 = pnand %p476_p9, %p732_p8 }
 0x152   : > { %p474_p11 = pneg %p473_p10 }
 0x154   : > { %608 = dma.done.wait (%p474_p11), %s378_s9, 512  }
 0x155   : > { %610 = vsyncadd (%p474_p11), %s378_s9, 4294966784  ;;  %s17_s22 = sadd.s32 1, %s641_s22   ;;  %s837_s15 = smov %s617_s16 }
 0x156   : > { %p14_p12 = scmp.ge.s32.totalorder %s17_s22, 6   ;;  %s838_s16 = smov %s621_s17 }
 0x157   : > { %s839_s17 = smov %s741_s7  ;;  %s840_s18 = smov %s633_s20 }
 0x158   : > { %s841_s19 = smov %s637_s21  ;;  %s842_s20 = smov %s845_s25 }
 0x159   : > { %s843_s21 = smov %s849_s26  ;;  %16 = sbr.rel (!%p14_p12) target bundleno = 5 (0x5), region = 71 }
 0x15e   :  { %384 = vsyncpa [#allocation3], 1 }
 0x15f   :  { %386 = vsyncpa [#allocation3 + $0x1], 1 }

</bundles_post_ra>
